<compile_context>
chip_gen: v5e
topology: v5e:2x2
jax: 0.10.0
libtpu: 0.0.40
codegen_flags: <defaults>
</compile_context>

<pallas_src>
import functools
import math

import jax
import jax.numpy as jnp
from jax.experimental import pallas as pl
from jax.experimental.pallas import tpu as pltpu

_EPS = 1e-6
_HALF_LOG_2PI = 0.5 * math.log(2.0 * math.pi)
_FILL_NLL = 1.0 / (2.0 * math.pi)
_BLOCK_TARGET_BYTES = 2 * 1024 * 1024          # ~2 MiB per f32 stream block


# ----------------------------------------------------------------------------- kernel math


def _elementwise_beta_nll(m, v, t, msk, beta, approx_reciprocal):
    """Per-element beta-NLL loss in float32. `msk` is a bool array or None."""
    v_nll = v if msk is None else jnp.where(msk, v, jnp.float32(_FILL_NLL))
    v_c = jnp.maximum(v_nll, jnp.float32(_EPS))
    diff = m - t
    if approx_reciprocal:
        quad = diff * diff * pl.reciprocal(v_c, approx=True)   # EUP vrcp, no Newton iter
    else:
        quad = diff * diff / v_c
    loss = 0.5 * (jnp.log(v_c) + quad) + jnp.float32(_HALF_LOG_2PI)
    if beta > 0.0:
        w = v if msk is None else jnp.where(msk, v, jnp.float32(0.0))
        if beta == 0.5:
            w = jnp.sqrt(w)                       # 1 EUP op instead of exp(b*log(x))
        elif beta != 1.0:
            w = w ** jnp.float32(beta)            # general beta fallback
        loss = loss * w
    return loss


def _load_f32(mean_ref, var_ref, tgt_ref, mask_ref):
    m = mean_ref[...].astype(jnp.float32)
    v = var_ref[...].astype(jnp.float32)
    t = tgt_ref[...].astype(jnp.float32)
    if mask_ref is None:
        msk = None
    else:
        mraw = mask_ref[...]
        msk = mraw if mraw.dtype == jnp.bool_ else (mraw != 0)
    return m, v, t, msk


def _edge_valid(shape, valid_b, valid_d):
    """Validity mask for wrapper-side padding (pure VPU work, only on padded inputs)."""
    bb, bd = shape
    row = pl.program_id(0) * bb + jax.lax.broadcasted_iota(jnp.int32, shape, 0)
    col = pl.program_id(1) * bd + jax.lax.broadcasted_iota(jnp.int32, shape, 1)
    return (row < valid_b) & (col < valid_d)


def _fold_to_8x128(x):
    """Fold a (bb, bd) f32 tile to an (8, 128) partial-sum tile with pure VPU adds."""
    bb, bd = x.shape
    part = x[:, 0:128]
    for c in range(1, bd // 128):                 # static, unrolled lane fold
        part = part + x[:, c * 128:(c + 1) * 128]
    acc = part[0:8, :]
    for r in range(1, bb // 8):                   # static, unrolled sublane fold
        acc = acc + part[r * 8:(r + 1) * 8, :]
    return acc


# ----------------------------------------------------------------------------- kernels


def _none_body(mean_ref, var_ref, tgt_ref, mask_ref, out_ref, beta, approx_reciprocal):
    m, v, t, msk = _load_f32(mean_ref, var_ref, tgt_ref, mask_ref)
    out_ref[...] = _elementwise_beta_nll(m, v, t, msk, beta, approx_reciprocal).astype(out_ref.dtype)


def _none_kernel_mask(mean_ref, var_ref, tgt_ref, mask_ref, out_ref, *, beta, approx_reciprocal):
    _none_body(mean_ref, var_ref, tgt_ref, mask_ref, out_ref, beta, approx_reciprocal)


def _none_kernel_nomask(mean_ref, var_ref, tgt_ref, out_ref, *, beta, approx_reciprocal):
    _none_body(mean_ref, var_ref, tgt_ref, None, out_ref, beta, approx_reciprocal)


def _psum_body(mean_ref, var_ref, tgt_ref, mask_ref, out_ref, beta, approx_reciprocal,
               valid_b, valid_d):
    m, v, t, msk = _load_f32(mean_ref, var_ref, tgt_ref, mask_ref)
    loss = _elementwise_beta_nll(m, v, t, msk, beta, approx_reciprocal)   # (bb, bd) f32
    if valid_b is not None:                       # zero pad contributions (padded inputs only)
        loss = jnp.where(_edge_valid(loss.shape, valid_b, valid_d), loss, jnp.float32(0.0))
    out_ref[...] = _fold_to_8x128(loss)


def _psum_kernel_mask(mean_ref, var_ref, tgt_ref, mask_ref, out_ref, *, beta,
                      approx_reciprocal, valid_b, valid_d):
    _psum_body(mean_ref, var_ref, tgt_ref, mask_ref, out_ref, beta, approx_reciprocal,
               valid_b, valid_d)


def _psum_kernel_nomask(mean_ref, var_ref, tgt_ref, out_ref, *, beta,
                        approx_reciprocal, valid_b, valid_d):
    _psum_body(mean_ref, var_ref, tgt_ref, None, out_ref, beta, approx_reciprocal,
               valid_b, valid_d)


# ----------------------------------------------------------------------------- wrapper helpers


def _pick_block(extent, target, align):
    """Largest multiple of `align` dividing `extent`, capped at `target`."""
    if extent % align != 0:
        return extent
    cap = max(align, min(target, extent))
    cap -= cap % align
    for cand in range(cap, 0, -align):
        if extent % cand == 0:
            return cand
    return extent


def _choose_blocks(Bp, Dp, sub_align, req_bb=None, req_bd=None):
    """Byte-targeted block selection (~2 MiB per f32 stream block)."""
    align_b = sub_align if Bp % sub_align == 0 else 8
    if req_bb is not None or req_bd is not None:
        bb = _pick_block(Bp, req_bb if req_bb else 256, align_b)
        bd = _pick_block(Dp, req_bd if req_bd else 2048, 128)
        return bb, bd
    target_elems = _BLOCK_TARGET_BYTES // 4
    bb = _pick_block(Bp, 256, align_b)
    bd = _pick_block(Dp, max(128, target_elems // bb), 128)
    if bb * bd < target_elems:                    # skinny D: grow bb to keep block volume up
        bb = _pick_block(Bp, max(align_b, target_elems // bd), align_b)
    return bb, bd


# ----------------------------------------------------------------------------- public API


def beta_nll_loss(mean, variance, target, mask=None, *,
                  reduction: str = "mean", beta: float = 0.5,
                  approx_reciprocal: bool = False, input_buffers: int = 2,
                  block_b: int | None = None, block_d: int | None = None):
    """JAX/Pallas equivalent of BetaNLLLoss.forward (forward only)."""
    if reduction not in ("none", "mean", "sum"):
        raise ValueError(
            f"argument `reduction` must be one of ('none', 'mean', 'sum'), is {reduction}.")
    if not 0.0 <= beta <= 1.0:
        raise ValueError(f"`beta` must be a value in the range [0, 1], is {beta}.")
    if mean.shape != variance.shape or mean.shape != target.shape:
        raise ValueError("mean/variance/target must have the same shape")

    orig_shape = mean.shape
    dtype = mean.dtype

    # Flatten to (B, D): B x "everything else" (the module's B x D convention).
    if mean.ndim >= 2:
        B = int(orig_shape[0])
        D = int(math.prod(orig_shape[1:]))
    else:
        B, D = 1, int(orig_shape[0])

    has_mask = mask is not None
    if has_mask and mask.shape != orig_shape:
        raise ValueError("mask must have the same shape as mean")

    # Wrapper-side padding to the (8, 128) layout grain instead of a full-extent fallback.
    Bp = ((B + 7) // 8) * 8
    Dp = ((D + 127) // 128) * 128
    padded = (Bp != B) or (Dp != D)

    def prep(x):
        x = x.reshape(B, D)
        if padded:
            x = jnp.pad(x, ((0, Bp - B), (0, Dp - D)))
        return x

    args = [prep(mean), prep(variance), prep(target)]
    if has_mask:
        # Pass bool/int8 masks straight through (no extra HBM astype pass); cast only wide masks.
        m_small = mask if mask.dtype.itemsize == 1 else mask.astype(jnp.int8)
        args.append(prep(m_small))

    narrow_data = jnp.dtype(dtype).itemsize <= 2
    sub_align = 32 if (has_mask or narrow_data) else 8
    bb, bd = _choose_blocks(Bp, Dp, sub_align, block_b, block_d)
    nb, nd = Bp // bb, Dp // bd
    grid = (nb, nd)

    # Data-stream BlockSpecs (optional 3-deep buffering sweep for v7x).
    if input_buffers and input_buffers > 2:
        data_spec = pl.BlockSpec((bb, bd), lambda i, j: (i, j),
                                 pipeline_mode=pl.Buffered(input_buffers))
    else:
        data_spec = pl.BlockSpec((bb, bd), lambda i, j: (i, j))
    in_specs = [data_spec] * len(args)

    # vmem limit from the actual (multi-)buffered block footprint, clamped to [32, 64] MiB.
    item = jnp.dtype(dtype).itemsize
    in_block_bytes = bb * bd * (3 * item + (1 if has_mask else 0))
    out_block_bytes = bb * bd * item if reduction == "none" else 8 * 128 * 4
    bufs = max(2, input_buffers or 2)
    need = bufs * in_block_bytes + 2 * out_block_bytes
    vmem_limit = int(min(max(int(need * 1.4) + (4 << 20), 32 << 20), 64 << 20))

    cparams = pltpu.CompilerParams(
        dimension_semantics=("parallel", "parallel"),
        vmem_limit_bytes=vmem_limit)

    if reduction == "none":
        kern = _none_kernel_mask if has_mask else _none_kernel_nomask
        out = pl.pallas_call(
            functools.partial(kern, beta=beta, approx_reciprocal=approx_reciprocal),
            out_shape=jax.ShapeDtypeStruct((Bp, Dp), dtype),
            grid_spec=pltpu.PrefetchScalarGridSpec(
                num_scalar_prefetch=0, grid=grid,
                in_specs=in_specs,
                out_specs=pl.BlockSpec((bb, bd), lambda i, j: (i, j))),
            compiler_params=cparams,
        )(*args)
        if padded:
            out = out[:B, :D]
        return out.reshape(orig_shape)

    # 'mean' / 'sum': per-block (8, 128) partial-sum tiles, tiny final reduce in the wrapper.
    kern = _psum_kernel_mask if has_mask else _psum_kernel_nomask
    valid_b = B if padded else None
    valid_d = D if padded else None
    partial_sums = pl.pallas_call(
        functools.partial(kern, beta=beta, approx_reciprocal=approx_reciprocal,
                          valid_b=valid_b, valid_d=valid_d),
        out_shape=jax.ShapeDtypeStruct((nb * 8, nd * 128), jnp.float32),
        grid_spec=pltpu.PrefetchScalarGridSpec(
            num_scalar_prefetch=0, grid=grid,
            in_specs=in_specs,
            out_specs=pl.BlockSpec((8, 128), lambda i, j: (i, j))),
        compiler_params=cparams,
    )(*args)
    total = jnp.sum(partial_sums, dtype=jnp.float32)
    if reduction == "mean":
        total = total / jnp.float32(B * D)
    return total.astype(dtype)


# ----------------------------------------------------------------------------- reference & demo


def _reference(mean, variance, target, mask, reduction, beta):
    """Pure-JAX reference mirroring the PyTorch module."""
    v_nll = variance if mask is None else jnp.where(mask, variance, _FILL_NLL)
    v_c = jnp.maximum(v_nll, _EPS)
    loss = 0.5 * (jnp.log(v_c) + (mean - target) ** 2 / v_c) + _HALF_LOG_2PI
    if beta > 0.0:
        w = variance if mask is None else jnp.where(mask, variance, 0.0)
        loss = loss * w ** beta
    if reduction == "mean":
        return loss.mean()
    if reduction == "sum":
        return loss.sum()
    return loss


if __name__ == "__main__":
    key = jax.random.PRNGKey(0)
    ok = True

    def make_inputs(shape, tag):
        k1, k2, k3, k4 = jax.random.split(jax.random.fold_in(key, tag), 4)
        mean = jax.random.normal(k1, shape, jnp.float32)
        target = jax.random.normal(k2, shape, jnp.float32)
        variance = jax.nn.softplus(jax.random.normal(k3, shape, jnp.float32)) + 0.1
        mask = jax.random.uniform(k4, shape) > 0.1       # ~90% valid, bool dtype
        return mean, variance, target, mask

    def check(mean, variance, target, msk, reduction, beta, rtol=1e-5, atol=1e-5, **kw):
        got = jax.block_until_ready(
            beta_nll_loss(mean, variance, target, msk, reduction=reduction, beta=beta, **kw))
        want = _reference(mean, variance, target, msk, reduction, beta)
        good = bool(jnp.allclose(got, want, rtol=rtol, atol=atol))
        if not good:
            print(f"MISMATCH at shape={mean.shape} red={reduction} beta={beta} "
                  f"mask={msk is not None} kw={kw}")
        return good

    # Aligned 2-D case: single-block and tiled (grid=(1,2)) configurations, bool mask.
    mean, var, tgt, mask = make_inputs((8, 256), 0)
    for reduction in ("mean", "sum", "none"):
        for msk in (None, mask):
            ok &= check(mean, var, tgt, msk, reduction, 0.5)
        ok &= check(mean, var, tgt, mask, reduction, 0.5, block_d=128)

    # beta edge cases (0 -> plain NLL, 1 -> equal weighting, 0.7 -> generic pow path).
    ok &= check(mean, var, tgt, mask, "mean", 0.0)
    ok &= check(mean, var, tgt, mask, "mean", 1.0)
    ok &= check(mean, var, tgt, mask, "sum", 0.7)

    # Wide (int32) mask exercises the cast-down path.
    ok &= check(mean, var, tgt, mask.astype(jnp.int32), "mean", 0.5)

    # Higher-rank small input: B=2, D=4*16 -> padded to (8, 128) (edge-mask / slice paths).
    mean, var, tgt, mask = make_inputs((2, 4, 16), 1)
    for reduction in ("mean", "sum", "none"):
        ok &= check(mean, var, tgt, mask, reduction, 0.5)
        ok &= check(mean, var, tgt, None, reduction, 0.5)
    ok &= check(mean, var, tgt, mask, "mean", 0.0)       # beta=0 + padding

    # D not a multiple of 128 / B not a multiple of 8.
    mean, var, tgt, mask = make_inputs((8, 200), 2)
    ok &= check(mean, var, tgt, mask, "mean", 0.5)
    ok &= check(mean, var, tgt, mask, "none", 0.5)
    mean, var, tgt, mask = make_inputs((6, 384), 3)
    ok &= check(mean, var, tgt, mask, "sum", 0.5)
    ok &= check(mean, var, tgt, None, "none", 0.0)

    # Optional approx-reciprocal path (looser tolerance; off by default).
    mean, var, tgt, mask = make_inputs((8, 256), 4)
    ok &= check(mean, var, tgt, mask, "mean", 0.5, rtol=1e-2, atol=1e-2,
                approx_reciprocal=True)

    print("KERNEL_OK" if ok else "MISMATCH")
</pallas_src>

<mosaic_0001>
module attributes {stable_mosaic.version = 11 : i64} {
  func.func @_psum_kernel_nomask(%arg0: i32, %arg1: i32, %arg2: memref<8x256xf32, #tpu.memory_space<vmem>>, %arg3: memref<8x256xf32, #tpu.memory_space<vmem>>, %arg4: memref<8x256xf32, #tpu.memory_space<vmem>>, %arg5: memref<8x128xf32, #tpu.memory_space<vmem>>) attributes {dimension_semantics = [#tpu.dimension_semantics<parallel>, #tpu.dimension_semantics<parallel>], iteration_bounds = array<i64: 1, 1>, scalar_prefetch = 0 : i64, scratch_operands = 0 : i64, tpu.core_type = #tpu.core_type<tc>, window_params = [{transform_indices = @transform_0, window_bounds = array<i64: 8, 256>}, {transform_indices = @transform_1, window_bounds = array<i64: 8, 256>}, {transform_indices = @transform_2, window_bounds = array<i64: 8, 256>}, {transform_indices = @transform_3, window_bounds = array<i64: 8, 128>}]} {
    %c0 = arith.constant 0 : index
    %c0_0 = arith.constant 0 : index
    %0 = vector.load %arg2[%c0, %c0_0] : memref<8x256xf32, #tpu.memory_space<vmem>>, vector<8x256xf32>
    %c0_1 = arith.constant 0 : index
    %c0_2 = arith.constant 0 : index
    %1 = vector.load %arg3[%c0_1, %c0_2] : memref<8x256xf32, #tpu.memory_space<vmem>>, vector<8x256xf32>
    %c0_3 = arith.constant 0 : index
    %c0_4 = arith.constant 0 : index
    %2 = vector.load %arg4[%c0_3, %c0_4] : memref<8x256xf32, #tpu.memory_space<vmem>>, vector<8x256xf32>
    %cst = arith.constant 9.99999997E-7 : f32
    %3 = vector.broadcast %cst : f32 to vector<8x256xf32>
    %4 = arith.maximumf %1, %3 : vector<8x256xf32>
    %5 = arith.subf %0, %2 : vector<8x256xf32>
    %6 = arith.mulf %5, %5 : vector<8x256xf32>
    %7 = arith.divf %6, %4 : vector<8x256xf32>
    %8 = math.log %4 : vector<8x256xf32>
    %9 = arith.addf %8, %7 : vector<8x256xf32>
    %cst_5 = arith.constant 5.000000e-01 : f32
    %10 = vector.broadcast %cst_5 : f32 to vector<8x256xf32>
    %11 = arith.mulf %10, %9 : vector<8x256xf32>
    %cst_6 = arith.constant 0.918938517 : f32
    %12 = vector.broadcast %cst_6 : f32 to vector<8x256xf32>
    %13 = arith.addf %11, %12 : vector<8x256xf32>
    %14 = math.sqrt %1 : vector<8x256xf32>
    %15 = arith.mulf %13, %14 : vector<8x256xf32>
    %16 = vector.extract_strided_slice %15 {offsets = [0, 0], sizes = [8, 128], strides = [1, 1]} : vector<8x256xf32> to vector<8x128xf32>
    %17 = vector.extract_strided_slice %15 {offsets = [0, 128], sizes = [8, 128], strides = [1, 1]} : vector<8x256xf32> to vector<8x128xf32>
    %18 = arith.addf %16, %17 : vector<8x128xf32>
    %c0_7 = arith.constant 0 : index
    %c0_8 = arith.constant 0 : index
    %19 = vector.load %arg5[%c0_7, %c0_8] : memref<8x128xf32, #tpu.memory_space<vmem>>, vector<8x128xf32>
    tpu.vector_store %arg5[%c0_7, %c0_8], %18 {strides = array<i32>} : memref<8x128xf32, #tpu.memory_space<vmem>>, vector<8x128xf32>,
    return
  }
  func.func @transform_0(%arg0: i32, %arg1: i32) -> (i32, i32) {
    %c0_i32 = arith.constant 0 : i32
    return %arg0, %arg1 : i32, i32
  }
  func.func @transform_1(%arg0: i32, %arg1: i32) -> (i32, i32) {
    %c0_i32 = arith.constant 0 : i32
    return %arg0, %arg1 : i32, i32
  }
  func.func @transform_2(%arg0: i32, %arg1: i32) -> (i32, i32) {
    %c0_i32 = arith.constant 0 : i32
    return %arg0, %arg1 : i32, i32
  }
  func.func @transform_3(%arg0: i32, %arg1: i32) -> (i32, i32) {
    %c0_i32 = arith.constant 0 : i32
    return %arg0, %arg1 : i32, i32
  }
}

</mosaic_0001>

<bundles_post_ra>
// kernel: tpu_custom_call.1
= control target key start
LH: loop header
LB: loop body
LE: loop exit
PB: predicated region body
PF: predicated region fallthrough
CT: control target
= control target key end

     0   :  { %8 = vsyncpa [#allocation3], 0  ;;  %s342_s0 = inlined_call_operand.hbm [shape: f32[8,256], index: 0, kind: input, shape index: {}]   ;;  %s343_s1 = inlined_call_operand.hbm [shape: f32[8,256], index: 1, kind: input, shape index: {}]   ;;  %s344_s2 = inlined_call_operand.hbm [shape: f32[8,256], index: 2, kind: input, shape index: {}]   ;;  %s345_s3 = inlined_call_operand.hbm [shape: f32[8,128], index: 3, kind: output, shape index: {}]  }
   0x1   :  { %9 = vsyncpa [#allocation6], 0  ;;  %s27_s14 = sshll.u32 %s343_s1, 4  ;;  %s28_s14 = int_to_ptr.hbm [resolvable:$true] %s27_s14 }
   0x2   :  { %10 = vsyncpa [#allocation4], 0  ;;  %s272_s15 = smov [#allocation5]   ;;  %s16_s19 = sshll.u32 %s342_s0, 4  ;;  %s17_s19 = int_to_ptr.hbm [resolvable:$true] %s16_s19 }
   0x3   :  { %s29_s16 = sshll.u32 %s272_s15, 4  ;;  %s273_s20 = smov [#allocation2]   ;;  %s30_s16 = int_to_ptr.vmem [resolvable:$true] %s29_s16 }
   0x4   :  { %32 = dma.hbm_to_vmem [thread:$0]  %s28_s14, 256, %s30_s16, [#allocation6]  }
   0x5   :  { %s18_s21 = sshll.u32 %s273_s20, 4  ;;  %s38_s24 = sshll.u32 %s344_s2, 4  ;;  %s19_s21 = int_to_ptr.vmem [resolvable:$true] %s18_s21  ;;  %s39_s24 = int_to_ptr.hbm [resolvable:$true] %s38_s24 }
   0x6   :  { %21 = dma.hbm_to_vmem [thread:$0]  %s17_s19, 256, %s19_s21, [#allocation3]  }
   0x7   :  { %s274_s1 = smov [#allocation7]  }
   0x8   :  { %s40_s25 = sshll.u32 %s274_s1, 4  ;;  %s41_s25 = int_to_ptr.vmem [resolvable:$true] %s40_s25 }
   0x9   :  { %43 = dma.hbm_to_vmem [thread:$0]  %s39_s24, 256, %s41_s25, [#allocation6]  }
   0xa   :  { %266 = dma.done.wait [#allocation3], 256  }
   0xb   :  { %267 = vsyncadd [#allocation3], 4294967040 }
   0xc   :  { %268 = dma.done.wait [#allocation6], 512  }
   0xd   :  { %269 = vsyncadd [#allocation6], 4294966784  ;;  %v305_v0 = vld [vmem:[#allocation5] sm:$0xff]  ;;  %v307_v1 = vld [vmem:[#allocation5 + $0x8] sm:$0xff]  ;;  %s275_s0 = smov [#allocation8]   ;;  %s143_s28 = sshll.u32 %s345_s3, 4  ;;  %s144_s28 = int_to_ptr.hbm [resolvable:$true] %s143_s28 }
   0xe   :  { %v62_v2 = vmax.f32 %v305_v0, 1e-06  ;;  %158 = vrsqrt.f32 %v305_v0  ;;  %v63_v3 = vmax.f32 %v307_v1, 1e-06  ;;  %v56_v4 = vld [vmem:[#allocation2] sm:$0xff]  ;;  %v57_v7 = vld [vmem:[#allocation2 + $0x8] sm:$0xff] }
   0xf   :  { %v60_v5 = vld [vmem:[#allocation7] sm:$0xff]  ;;  %v61_v8 = vld [vmem:[#allocation7 + $0x8] sm:$0xff]  ;;  %vm115_vm8 = vcmp.eq.f32.partialorder %v305_v0, inf  ;;  %v118_v51 = vand.u32 2147483648, %v305_v0  ;;  %vm117_vm9 = vcmp.eq.f32.partialorder %v305_v0, 0.0  ;;  %vm127_vm10 = vcmp.eq.f32.partialorder %v307_v1, inf }
  0x10   :  { %160 = vrcp.f32 %v62_v2  ;;  %v64_v11 = vsub.f32 %v56_v4, %v60_v5  ;;  %v65_v13 = vsub.f32 %v57_v7, %v61_v8  ;;  %vm73_vm0 = vweird.f32 %v62_v2  ;;  %s141_s2 = sshll.u32 %s275_s0, 4  ;;  %s142_s2 = int_to_ptr.vmem [resolvable:$true] %s141_s2 }
  0x11   :  { %162 = vrcp.f32 %v63_v3  ;;  %v77_v16 = vand.u32 2147483647, %v62_v2  ;;  %v79_v17 = vand.u32 2147483648, %v62_v2  ;;  %v94_v20 = vand.u32 2147483648, %v63_v3 }
  0x12   :  { %164 = vrsqrt.f32 %v307_v1  ;;  %vm88_vm2 = vweird.f32 %v63_v3  ;;  %v92_v23 = vand.u32 2147483647, %v63_v3  ;;  %v66_v28 = vmul.f32 %v64_v11, %v64_v11 }
  0x13   :  { %166 = vlog2.f32 %v62_v2  ;;  %v80_v30 = vor.u32 1.1754944e-38, %v79_v17  ;;  %vm78_vm5 = vcmp.eq.f32.partialorder %v77_v16, 8.507059e+37  ;;  %v95_v36 = vor.u32 1.1754944e-38, %v94_v20 }
  0x14   :  { %v159_v6 = vpop.eup %158  ;;  %168 = vlog2.f32 %v63_v3  ;;  %v67_v38 = vmul.f32 %v65_v13, %v65_v13  ;;  %vm93_vm7 = vcmp.eq.f32.partialorder %v92_v23, 8.507059e+37  ;;  %v130_v58 = vand.u32 2147483648, %v307_v1 }
  0x15   :  { %v109_v9 = vmul.f32 %v159_v6, %v305_v0  ;;  %vm129_vm11 = vcmp.eq.f32.partialorder %v307_v1, 0.0 }
  0x16   :  { %v161_v10 = vpop.eup %160 }
  0x17   :  { %v163_v12 = vpop.eup %162  ;;  %v69_v14 = vmul.f32 %v161_v10, %v62_v2  ;;  %v110_v15 = vmul.f32 %v159_v6, %v109_v9  ;;  %vm74_vm1 = vweird.f32 %v161_v10 }
  0x18   :  { %v84_v18 = vmul.f32 %v163_v12, %v63_v3  ;;  %vm89_vm3 = vweird.f32 %v163_v12  ;;  %v165_v24 = vpop.eup %164  ;;  %vm315_vm4 = vmor %vm73_vm0, %vm74_vm1 }
  0x19   :  { %v70_v19 = vsub.f32 1.0, %v69_v14  ;;  %v111_v21 = vmul.f32 0.5, %v110_v15  ;;  %v167_v27 = vpop.eup %166  ;;  %v121_v32 = vmul.f32 %v165_v24, %v307_v1  ;;  %vm321_vm6 = vmor %vm88_vm2, %vm89_vm3 }
  0x1a   :  { %v85_v22 = vsub.f32 1.0, %v84_v18  ;;  %v169_v33 = vpop.eup %168  ;;  %v99_v42 = vmul.f32 0.6931472, %v167_v27 }
  0x1b   :  { %v71_v25 = vmul.f32 %v161_v10, %v70_v19  ;;  %v112_v26 = vsub.f32 1.5, %v111_v21  ;;  %v122_v40 = vmul.f32 %v165_v24, %v121_v32  ;;  %v101_v46 = vmul.f32 0.6931472, %v169_v33 }
  0x1c   :  { %v86_v31 = vmul.f32 %v163_v12, %v85_v22 }
  0x1d   :  { %v72_v34 = vadd.f32 %v161_v10, %v71_v25  ;;  %v113_v37 = vmul.f32 %v159_v6, %v112_v26  ;;  %v123_v47 = vmul.f32 0.5, %v122_v40 }
  0x1e   :  { %v87_v39 = vadd.f32 %v163_v12, %v86_v31 }
  0x1f   :  { %v76_v41 = vsel %vm315_vm4, %v161_v10, %v72_v34  ;;  %v114_v43 = vmul.f32 %v113_v37, %v305_v0  ;;  %v124_v52 = vsub.f32 1.5, %v123_v47 }
  0x20   :  { %v81_v44 = vsel %vm78_vm5, %v80_v30, %v76_v41  ;;  %v91_v45 = vsel %vm321_vm6, %v163_v12, %v87_v39 }
  0x21   :  { %v82_v48 = vmul.f32 %v81_v44, %v66_v28  ;;  %v96_v49 = vsel %vm93_vm7, %v95_v36, %v91_v45  ;;  %v116_v54 = vsel %vm115_vm8, %v305_v0, %v114_v43  ;;  %v125_v56 = vmul.f32 %v165_v24, %v124_v52 }
  0x22   :  { %v97_v50 = vmul.f32 %v96_v49, %v67_v38  ;;  %v119_v60 = vsel %vm117_vm9, %v118_v51, %v116_v54 }
  0x23   :  { %v102_v53 = vadd.f32 %v99_v42, %v82_v48  ;;  %v126_v61 = vmul.f32 %v125_v56, %v307_v1 }
  0x24   :  { %v103_v55 = vadd.f32 %v101_v46, %v97_v50 }
  0x25   :  { %v104_v57 = vmul.f32 0.5, %v102_v53  ;;  %v128_v2 = vsel %vm127_vm10, %v307_v1, %v126_v61 }
  0x26   :  { %v105_v59 = vmul.f32 0.5, %v103_v55  ;;  %v131_v3 = vsel %vm129_vm11, %v130_v58, %v128_v2 }
  0x27   :  { %v106_v62 = vadd.f32 0.9189385, %v104_v57 }
  0x28   :  { %v107_v63 = vadd.f32 0.9189385, %v105_v59 }
  0x29   :  { %v132_v4 = vmul.f32 %v119_v60, %v106_v62 }
  0x2a   :  { %v133_v0 = vmul.f32 %v131_v3, %v107_v63 }
  0x2c   :  { %v134_v5 = vadd.f32 %v133_v0, %v132_v4 }
  0x2e   :  { %135 = vst [vmem:[#allocation8] sm:$0xff] %v134_v5 }
  0x2f   :  { %146 = dma.vmem_to_hbm [thread:$0]  %s142_s2, 128, %s144_s28, [#allocation4]  }
  0x30   :  { %270 = dma.done.wait [#allocation4], 128  }
  0x31   :  { %271 = vsyncadd [#allocation4], 4294967168 }
  0x32   :  { %151 = vsyncpa [#allocation3], 1 }
  0x33   :  { %152 = vsyncpa [#allocation6], 1 }
  0x34   :  { %153 = vsyncpa [#allocation4], 1 }

</bundles_post_ra>
